<compile_context>
chip_gen: v7x
topology: tpu7x:2x2x1
jax: 0.10.0
libtpu: 0.0.40
codegen_flags: <defaults>
</compile_context>

<pallas_src>
import functools
import math

import jax
import jax.numpy as jnp
from jax.experimental import pallas as pl
from jax.experimental.pallas import tpu as pltpu

_MiB = 1024 * 1024


# ---------------------------------------------------------------------------
# hardware / layout helpers
# ---------------------------------------------------------------------------
def _vmem_capacity_bytes():
    """Physical VMEM per TensorCore; conservative (v7x) fallback if query fails."""
    try:
        return int(pltpu.get_tpu_info().vmem_capacity_bytes)
    except Exception:
        return 64 * _MiB


def _sublane_multiple(dtype):
    """Minimum packed sublane tile: 8 (f32) / 16 (bf16) / 32 (int8 / fp8)."""
    itemsize = jnp.dtype(dtype).itemsize
    return max(8, 32 // max(1, itemsize))


def _pick_lane_fold(K, N):
    """Smallest divisor r of K with folded lane width r*N >= 128 (preferring an
    exact multiple of 128).  Returns 1 if N is already lane-dense.  The
    matching reshape (M, K, N) -> (M, K//r, r*N) is contiguous, hence free."""
    if N >= 128 or K <= 1:
        return 1
    divisors = [d for d in range(1, K + 1) if K % d == 0]
    for d in divisors:
        if d * N >= 128 and (d * N) % 128 == 0:
            return d
    for d in divisors:
        if d * N >= 128:
            return d
    return divisors[-1]          # = K; only when K*N < 128 (tiny anyway)


# ---------------------------------------------------------------------------
# kernel
# ---------------------------------------------------------------------------
def _mean_pool_kernel(x_ref, o_ref, *scratch, inv_k, kp_rem, r, n_out, acc_is_out):
    """One (bm, tk, Np) tile: accumulate partial sums over axis 1; on the last
    K step fold the r lane-groups (if any) and write mean = acc * (1/K).

    Grid = (M_tiles, K_tiles), reduction axis last ("arbitrary"); the output
    block and the accumulator stay resident in VMEM across the K axis.

    NOTE: when bm does not divide M the last M tile contains padded garbage
    rows.  All math here is strictly per-row (axis-1 sums and within-row lane
    folds), so garbage rows never contaminate valid rows and Pallas discards
    them on writeback.
    """
    acc_ref = o_ref if acc_is_out else scratch[0]
    k_idx = pl.program_id(1)
    last = pl.num_programs(1) - 1

    @pl.when(k_idx == 0)
    def _init():
        acc_ref[...] = jnp.zeros_like(acc_ref)

    def _accum(nrows):
        x = x_ref[...] if nrows is None else x_ref[:, 0:nrows, :]
        if x.dtype != jnp.float32:
            x = x.astype(jnp.float32)       # widen (bf16 / int) for accumulation
        acc_ref[...] += jnp.sum(x, axis=1).astype(acc_ref.dtype)

    if kp_rem is None:                       # tk divides Kp: no remainder step
        _accum(None)
    else:
        @pl.when(k_idx < last)
        def _full_step():
            _accum(None)

        @pl.when(k_idx == last)
        def _remainder_step():
            _accum(kp_rem)                   # static sub-slice, no iota/select

    @pl.when(k_idx == last)
    def _finalize():
        acc = acc_ref[...].astype(jnp.float32)
        if r > 1:
            # Collapse the r lane-groups introduced by the lane-density
            # reshape (M, K, N) -> (M, K//r, r*N); once per output tile.
            folded = acc[:, 0:n_out]
            for g in range(1, r):
                folded = folded + acc[:, g * n_out:(g + 1) * n_out]
            acc = folded
        o_ref[...] = (acc * inv_k).astype(o_ref.dtype)


# ---------------------------------------------------------------------------
# tiling heuristics
# ---------------------------------------------------------------------------
def _choose_tiles(M, Kp, Np, n_out, itemsize, sub_mult, total_budget, need_acc,
                  tk=None):
    """Pick (bm, tk) filling `total_budget` bytes of VMEM:
        footprint = 2*bm*tk*Np*itemsize   (double-buffered input blocks)
                  + 2*bm*n_out*itemsize   (double-buffered output blocks)
                  + [bm*Np*4]             (f32 accumulator scratch, if used)
    Prefer full Kp (single reduction step); otherwise a dtype-legal tk that
    divides Kp when possible.  No artificial minimum number of grid steps:
    fewer, bigger tiles sit closer to the HBM roofline.
    """
    per_row_fixed = 2 * n_out * itemsize + (Np * 4 if need_acc else 0)

    def per_row(t):
        return 2 * t * Np * itemsize + per_row_fixed

    if tk is None:
        tk = Kp
        if total_budget // per_row(tk) < sub_mult:
            # Shrink tk so that at least `sub_mult` M rows fit the budget.
            max_in = total_budget // sub_mult - per_row_fixed
            tk = max(sub_mult,
                     max_in // (2 * Np * itemsize) // sub_mult * sub_mult)
            tk = min(tk, Kp)
            if Kp % tk != 0:
                # Prefer a tk that divides Kp (removes the remainder step).
                for cand in range(tk, sub_mult - 1, -sub_mult):
                    if Kp % cand == 0:
                        tk = cand
                        break
    tk = int(min(tk, Kp))
    if tk < Kp and tk % sub_mult:
        tk = max(sub_mult, tk // sub_mult * sub_mult)

    bm = total_budget // per_row(tk)
    if bm >= M:
        bm = M                                # full dim: always layout-legal
    else:
        bm = max(sub_mult, bm // sub_mult * sub_mult)
    # TODO(synk): on v7x (2 TensorCores) keep the M grid an even number of
    # steps and/or use pltpu.CORE_PARALLEL so both cores get work.
    return int(bm), int(tk)


# ---------------------------------------------------------------------------
# pallas_call wrapper
# ---------------------------------------------------------------------------
def _mean_pool_3d(x3, *, k_true, r=1, bm=None, tk=None):
    """x3: (M, Kp, Np) -> (M, Np // r) mean over the collapsed axis.  `k_true`
    is the original collapsed extent K (Kp = K // r after the lane fold)."""
    M, Kp, Np = x3.shape
    assert Np % r == 0
    n_out = Np // r
    dtype = x3.dtype
    itemsize = jnp.dtype(dtype).itemsize
    sub_mult = _sublane_multiple(dtype)

    need_acc = (r > 1) or (dtype != jnp.float32)

    cap = _vmem_capacity_bytes()
    total_budget = min(cap // 2, 32 * _MiB)    # generation-aware footprint cap

    auto_bm, tk = _choose_tiles(M, Kp, Np, n_out, itemsize, sub_mult,
                                total_budget, need_acc, tk=tk)
    bm = auto_bm if bm is None else int(bm)

    nm = -(-M // bm)
    nk = -(-Kp // tk)
    kp_rem = None if nk * tk == Kp else Kp - (nk - 1) * tk

    footprint = (2 * bm * tk * Np * itemsize
                 + 2 * bm * n_out * itemsize
                 + (bm * Np * 4 if need_acc else 0))
    vmem_limit = int(min(cap * 0.9,
                         max(footprint + max(footprint // 2, 2 * _MiB),
                             16 * _MiB)))

    kernel = functools.partial(
        _mean_pool_kernel,
        inv_k=1.0 / float(k_true), kp_rem=kp_rem, r=r, n_out=n_out,
        acc_is_out=not need_acc)

    scratch = (pltpu.VMEM((bm, Np), jnp.float32),) if need_acc else ()

    return pl.pallas_call(
        kernel,
        out_shape=jax.ShapeDtypeStruct((M, n_out), dtype),
        grid=(nm, nk),                                    # reduction axis last
        in_specs=[pl.BlockSpec((bm, tk, Np), lambda i, k: (i, k, 0))],
        out_specs=pl.BlockSpec((bm, n_out), lambda i, k: (i, 0)),
        scratch_shapes=scratch,
        compiler_params=pltpu.CompilerParams(
            dimension_semantics=("parallel", "arbitrary"),
            vmem_limit_bytes=vmem_limit,
        ),
    )(x3)


# ---------------------------------------------------------------------------
# module-level glue (mirrors EfficientAT's collapse_dim)
# ---------------------------------------------------------------------------
def collapse_dim_pallas(x, dim, mode="pool", pool_fn=None, combine_dim=None,
                        min_pallas_bytes=4 * _MiB):
    """JAX/Pallas equivalent of EfficientAT's collapse_dim.

    mode='pool' with the default mean pool runs the Pallas reduction kernel;
    other pool_fn callables and mode='combine' (pure view) stay in JAX.  The
    Pallas path only engages above `min_pallas_bytes`: for small inputs (and
    anything XLA could fuse with neighbouring elementwise ops) the fused XLA
    reduce is already at the HBM roofline and keeping the fusion is worth more
    than any in-kernel tuning.
    """
    ndim = x.ndim
    if mode == "pool":
        if pool_fn is not None:
            # TODO(synk): only mean pooling has a Pallas kernel; other pool
            # functions fall back to the provided callable.
            return pool_fn(x, dim)
        d = dim % ndim
        shp = x.shape
        M = int(math.prod(shp[:d])) if d > 0 else 1
        K = int(shp[d])
        N = int(math.prod(shp[d + 1:])) if d + 1 < ndim else 1
        nbytes = x.size * jnp.dtype(x.dtype).itemsize
        if nbytes < min_pallas_bytes or K == 1:
            return jnp.mean(x, axis=d)
        r = _pick_lane_fold(K, N)
        x3 = jnp.reshape(x, (M, K // r, r * N))   # contiguous (free) reshape
        y = _mean_pool_3d(x3, k_true=K, r=r)
        return jnp.reshape(y, shp[:d] + shp[d + 1:])
    elif mode == "combine":
        # Pure metadata reshape (torch .view): no compute -> plain JAX.
        s = list(x.shape)
        s[combine_dim] *= dim
        s[dim] //= dim
        return jnp.reshape(x, s)
    else:
        raise ValueError(f"unknown mode {mode}")


class CollapseDim:
    """Mirror of the PyTorch module (no parameters)."""

    def __init__(self, dim, mode="pool", pool_fn=None, combine_dim=None):
        self.dim = dim
        self.mode = mode
        self.pool_fn = pool_fn
        self.combine_dim = combine_dim

    def __call__(self, x):
        return collapse_dim_pallas(
            x, dim=self.dim, mode=self.mode, pool_fn=self.pool_fn,
            combine_dim=self.combine_dim)


if __name__ == "__main__":
    key = jax.random.PRNGKey(0)
    k1, k2, k3 = jax.random.split(key, 3)

    # 1) Module-level demo at a small NCHW shape (B=2, C=4, H=16, W=16),
    #    collapsing the frequency axis (dim=2).  Small input -> XLA fast path.
    x_small = jax.random.normal(k1, (2, 4, 16, 16), dtype=jnp.float32)
    mod = CollapseDim(dim=2, mode="pool")
    y_small = jax.block_until_ready(mod(x_small))
    assert y_small.shape == (2, 4, 16), y_small.shape
    assert jnp.allclose(y_small, jnp.mean(x_small, axis=2), atol=1e-5, rtol=1e-5)

    # 2) Same small input forced through the Pallas kernel: exercises the
    #    lane-density fold (N=16 < 128 -> r=8, lane width 128) and the
    #    finalize lane-group reduction.
    y_forced = jax.block_until_ready(
        collapse_dim_pallas(x_small, dim=2, mode="pool", min_pallas_bytes=0))
    assert jnp.allclose(y_forced, jnp.mean(x_small, axis=2), atol=1e-5, rtol=1e-5)

    # 3) Lane-dense f32 case with a forced small K tile: exercises the
    #    multi-step K accumulator, the remainder step (50 % 16 != 0) and the
    #    accumulate-directly-into-o_ref fast path (no scratch).
    x_med = jax.random.normal(k2, (4, 8, 50, 128), dtype=jnp.float32)
    y_med = jax.block_until_ready(
        _mean_pool_3d(jnp.reshape(x_med, (32, 50, 128)), k_true=50, r=1, tk=16))
    assert jnp.allclose(jnp.reshape(y_med, (4, 8, 128)),
                        jnp.mean(x_med, axis=2), atol=1e-5, rtol=1e-5)

    # 4) bf16 input: exercises the dtype-aware sublane tiling and the f32
    #    scratch accumulator path.
    x_bf = jax.random.normal(k3, (2, 4, 64, 128),
                             dtype=jnp.float32).astype(jnp.bfloat16)
    y_bf = jax.block_until_ready(
        collapse_dim_pallas(x_bf, dim=2, mode="pool", min_pallas_bytes=0))
    ref_bf = jnp.mean(x_bf.astype(jnp.float32), axis=2)
    assert y_bf.dtype == jnp.bfloat16
    assert jnp.allclose(y_bf.astype(jnp.float32), ref_bf, atol=2e-2, rtol=2e-2)

    # 5) Combine mode sanity check (pure reshape semantics of torch .view).
    mod_c = CollapseDim(dim=2, mode="combine", combine_dim=1)
    y_c = jax.block_until_ready(mod_c(x_small))
    assert y_c.shape == (2, 4 * 2, 16 // 2, 16), y_c.shape

    print("KERNEL_OK")
</pallas_src>

<mosaic_0001>
module attributes {stable_mosaic.version = 11 : i64} {
  func.func @_mean_pool_kernel(%arg0: i32, %arg1: i32, %arg2: memref<8x2x128xf32, #tpu.memory_space<vmem>>, %arg3: memref<8x16xf32, #tpu.memory_space<vmem>>, %arg4: memref<8x128xf32, #tpu.memory_space<vmem>>) attributes {dimension_semantics = [#tpu.dimension_semantics<parallel>, #tpu.dimension_semantics<arbitrary>], iteration_bounds = array<i64: 1, 1>, scalar_prefetch = 0 : i64, scratch_operands = 1 : i64, tpu.core_type = #tpu.core_type<tc>, window_params = [{transform_indices = @transform_0, window_bounds = array<i64: 8, 2, 128>}, {transform_indices = @transform_1, window_bounds = array<i64: 8, 16>}]} {
    %c0_i32 = arith.constant 0 : i32
    %0 = arith.cmpi eq, %arg1, %c0_i32 : i32
    %1 = arith.extui %0 : i1 to i32
    %c0_i32_0 = arith.constant 0 : i32
    %2 = arith.cmpi ne, %1, %c0_i32_0 : i32
    scf.if %2 {
      %cst_9 = arith.constant 0.000000e+00 : f32
      %11 = vector.broadcast %cst_9 : f32 to vector<8x128xf32>
      %c0_10 = arith.constant 0 : index
      %c0_11 = arith.constant 0 : index
      %12 = vector.load %arg4[%c0_10, %c0_11] : memref<8x128xf32, #tpu.memory_space<vmem>>, vector<8x128xf32>
      tpu.vector_store %arg4[%c0_10, %c0_11], %11 {strides = array<i32>} : memref<8x128xf32, #tpu.memory_space<vmem>>, vector<8x128xf32>,
    } else {
    }
    %c0 = arith.constant 0 : index
    %c0_1 = arith.constant 0 : index
    %c0_2 = arith.constant 0 : index
    %3 = vector.load %arg2[%c0, %c0_1, %c0_2] : memref<8x2x128xf32, #tpu.memory_space<vmem>>, vector<8x2x128xf32>
    %c0_3 = arith.constant 0 : index
    %c0_4 = arith.constant 0 : index
    %4 = vector.load %arg4[%c0_3, %c0_4] : memref<8x128xf32, #tpu.memory_space<vmem>>, vector<8x128xf32>
    %cst = arith.constant dense<0.000000e+00> : vector<8x128xf32>
    %5 = vector.multi_reduction <add>, %3, %cst [1] : vector<8x2x128xf32> to vector<8x128xf32>
    %6 = arith.addf %4, %5 : vector<8x128xf32>
    %c0_5 = arith.constant 0 : index
    %c0_6 = arith.constant 0 : index
    %7 = vector.load %arg4[%c0_5, %c0_6] : memref<8x128xf32, #tpu.memory_space<vmem>>, vector<8x128xf32>
    tpu.vector_store %arg4[%c0_5, %c0_6], %6 {strides = array<i32>} : memref<8x128xf32, #tpu.memory_space<vmem>>, vector<8x128xf32>,
    %c0_i32_7 = arith.constant 0 : i32
    %8 = arith.cmpi eq, %arg1, %c0_i32_7 : i32
    %9 = arith.extui %8 : i1 to i32
    %c0_i32_8 = arith.constant 0 : i32
    %10 = arith.cmpi ne, %9, %c0_i32_8 : i32
    scf.if %10 {
      %c0_9 = arith.constant 0 : index
      %c0_10 = arith.constant 0 : index
      %11 = vector.load %arg4[%c0_9, %c0_10] : memref<8x128xf32, #tpu.memory_space<vmem>>, vector<8x128xf32>
      %12 = vector.extract_strided_slice %11 {offsets = [0, 0], sizes = [8, 16], strides = [1, 1]} : vector<8x128xf32> to vector<8x16xf32>
      %13 = vector.extract_strided_slice %11 {offsets = [0, 16], sizes = [8, 16], strides = [1, 1]} : vector<8x128xf32> to vector<8x16xf32>
      %14 = arith.addf %12, %13 : vector<8x16xf32>
      %15 = vector.extract_strided_slice %11 {offsets = [0, 32], sizes = [8, 16], strides = [1, 1]} : vector<8x128xf32> to vector<8x16xf32>
      %16 = arith.addf %14, %15 : vector<8x16xf32>
      %17 = vector.extract_strided_slice %11 {offsets = [0, 48], sizes = [8, 16], strides = [1, 1]} : vector<8x128xf32> to vector<8x16xf32>
      %18 = arith.addf %16, %17 : vector<8x16xf32>
      %19 = vector.extract_strided_slice %11 {offsets = [0, 64], sizes = [8, 16], strides = [1, 1]} : vector<8x128xf32> to vector<8x16xf32>
      %20 = arith.addf %18, %19 : vector<8x16xf32>
      %21 = vector.extract_strided_slice %11 {offsets = [0, 80], sizes = [8, 16], strides = [1, 1]} : vector<8x128xf32> to vector<8x16xf32>
      %22 = arith.addf %20, %21 : vector<8x16xf32>
      %23 = vector.extract_strided_slice %11 {offsets = [0, 96], sizes = [8, 16], strides = [1, 1]} : vector<8x128xf32> to vector<8x16xf32>
      %24 = arith.addf %22, %23 : vector<8x16xf32>
      %25 = vector.extract_strided_slice %11 {offsets = [0, 112], sizes = [8, 16], strides = [1, 1]} : vector<8x128xf32> to vector<8x16xf32>
      %26 = arith.addf %24, %25 : vector<8x16xf32>
      %cst_11 = arith.constant 6.250000e-02 : f32
      %27 = vector.broadcast %cst_11 : f32 to vector<8x16xf32>
      %28 = arith.mulf %26, %27 : vector<8x16xf32>
      %c0_12 = arith.constant 0 : index
      %c0_13 = arith.constant 0 : index
      %29 = vector.load %arg3[%c0_12, %c0_13] : memref<8x16xf32, #tpu.memory_space<vmem>>, vector<8x16xf32>
      tpu.vector_store %arg3[%c0_12, %c0_13], %28 {strides = array<i32>} : memref<8x16xf32, #tpu.memory_space<vmem>>, vector<8x16xf32>,
    } else {
    }
    return
  }
  func.func @transform_0(%arg0: i32, %arg1: i32) -> (i32, i32, i32) {
    %c0_i32 = arith.constant 0 : i32
    %c0_i32_0 = arith.constant 0 : i32
    return %arg0, %arg1, %c0_i32 : i32, i32, i32
  }
  func.func @transform_1(%arg0: i32, %arg1: i32) -> (i32, i32) {
    %c0_i32 = arith.constant 0 : i32
    %c0_i32_0 = arith.constant 0 : i32
    return %arg0, %c0_i32 : i32, i32
  }
}

</mosaic_0001>

<bundles_post_ra>
// kernel: tpu_custom_call.1
= control target key start
LH: loop header
LB: loop body
LE: loop exit
PB: predicated region body
PF: predicated region fallthrough
CT: control target
= control target key end

     0   :  { %6 = vsyncpa [#allocation4], 0  ;;  %s286_s0 = inlined_call_operand.hbm [shape: f32[8,2,128], index: 0, kind: input, shape index: {}]   ;;  %s287_s1 = inlined_call_operand.hbm [shape: f32[8,16], index: 1, kind: output, shape index: {}]  }
   0x1   :  { %7 = vsyncpa [#allocation5], 0  ;;  %s228_s6 = smov [#allocation3]   ;;  %s180_s10 = scalar_lea.hbm %s286_s0, 256 }
   0x2   :  { %s13_s7 = sshll.u32 %s228_s6, 4  ;;  %p181_p0 = scmp.ne.s32.totalorder %s286_s0, %s180_s10  ;;  %s14_s7 = int_to_ptr.vmem [resolvable:$true] %s13_s7 }
   0x3   :  { %p184_p1 = scmp.lt.u32.totalorder %s180_s10, %s286_s0 }
   0x5   :  { %p186_p2 = pnand %p184_p1, %p181_p0 }
   0x7   :  { %189 = shalt.err (!%p186_p2)
}
   0x8   :  { %s190_s15 = scalar_lea.vmem %s14_s7, 256  ;;  %p195_p4 = scmp.lt.s32.totalorder %s14_s7, %s14_s7 }
   0x9   :  { %p191_p3 = scmp.ne.s32.totalorder %s14_s7, %s190_s15  ;;  %p196_p5 = scmp.lt.s32.totalorder %s190_s15, %s190_s15 }
   0xb   :  { %p197_p6 = por %p196_p5, %p195_p4 }
   0xd   :  { %p198_p7 = pnand %p197_p6, %p191_p3 }
   0xf   :  { %201 = shalt.err (!%p198_p7)
}
  0x10   :  { %s229_s16 = smov 32   ;;  %s230_s17 = smov 2  }
  0x11   :  { %19 = dma.hbm_to_vmem [thread:$0]  %s286_s0, 256, %s14_s7, [#allocation4], %s229_s16, %s229_s16, %s230_s17  }
  0x12   :  { %224 = dma.done.wait [#allocation4], 256  }
  0x13   :  { %225 = vsyncadd [#allocation4], 4294967040  ;;  %vm37_vm0 = vcmask 1041408   ;;  %v28_v0 = vld [vmem:[#allocation3] sm:$0x3]  ;;  %vm102_vm1 = vcmask 1041409  }
  0x14   :  { %v29_v1 = vld [vmem:[#allocation3 + $0x2] sm:$0x3]  ;;  %v30_v2 = vld [vmem:[#allocation3 + $0x4] sm:$0x3]  ;;  %v31_v3 = vld [vmem:[#allocation3 + $0x6] sm:$0x3] }
  0x15   :  { %v32_v4 = vld [vmem:[#allocation3 + $0x8] sm:$0x3]  ;;  %v33_v5 = vld [vmem:[#allocation3 + $0xa] sm:$0x3]  ;;  %v34_v6 = vld [vmem:[#allocation3 + $0xc] sm:$0x3] }
  0x16   :  { %v38_v7 = vsel %vm37_vm0, %v28_v0, 0.0  ;;  %v45_v8 = vsel %vm37_vm0, %v29_v1, 0.0  ;;  %v35_v9 = vld [vmem:[#allocation3 + $0xe] sm:$0x3]  ;;  %v52_v12 = vsel %vm37_vm0, %v30_v2, 0.0  ;;  %v59_v13 = vsel %vm37_vm0, %v31_v3, 0.0 }
  0x17   :  { %v39_v10 = vrot.slane %v38_v7, 4  ;;  %v46_v11 = vrot.slane %v45_v8, 4  ;;  %v53_v14 = vrot.slane %v52_v12, 4  ;;  %v60_v15 = vrot.slane %v59_v13, 4  ;;  %s231_s0 = smov 112   ;;  %s232_s20 = smov 80  }
  0x18   :  { %v66_v16 = vsel %vm37_vm0, %v32_v4, 0.0  ;;  %v73_v17 = vsel %vm37_vm0, %v33_v5, 0.0  ;;  %vm104_vm2 = vcmask 1042434   ;;  %v80_v24 = vsel %vm37_vm0, %v34_v6, 0.0  ;;  %s233_s21 = smov 96   ;;  %s234_s22 = smov 64  }
  0x19   :  { %v40_v18 = vadd.f32 %v39_v10, %v38_v7  ;;  %v47_v19 = vadd.f32 %v46_v11, %v45_v8  ;;  %v67_v20 = vrot.slane %v66_v16, 4  ;;  %v74_v21 = vrot.slane %v73_v17, 4  ;;  %s235_s23 = smov 48   ;;  %s236_s24 = smov 16  }
  0x1a   :  { %v54_v22 = vadd.f32 %v53_v14, %v52_v12  ;;  %v61_v23 = vadd.f32 %v60_v15, %v59_v13  ;;  %v87_v25 = vsel %vm37_vm0, %v35_v9, 0.0  ;;  %vm106_vm3 = vcmask 1043459   ;;  %s237_s25 = smov [#allocation6]  }
  0x1b   :  { %v41_v26 = vrot.slane %v40_v18, 2  ;;  %v48_v27 = vrot.slane %v47_v19, 2  ;;  %v68_v28 = vadd.f32 %v67_v20, %v66_v16  ;;  %v75_v29 = vadd.f32 %v74_v21, %v73_v17  ;;  %s161_s26 = sshll.u32 %s237_s25, 4  ;;  %s162_s26 = int_to_ptr.vmem [resolvable:$true] %s161_s26 }
  0x1c   :  { %v55_v30 = vrot.slane %v54_v22, 2  ;;  %v62_v31 = vrot.slane %v61_v23, 2  ;;  %v81_v32 = vrot.slane %v80_v24, 4  ;;  %v88_v33 = vrot.slane %v87_v25, 4  ;;  %s202_s27 = scalar_lea.vmem %s162_s26, 128  ;;  %p207_p9 = scmp.lt.s32.totalorder %s162_s26, %s162_s26 }
  0x1d   :  { %v42_v34 = vadd.f32 %v41_v26, %v40_v18  ;;  %v49_v35 = vadd.f32 %v48_v27, %v47_v19  ;;  %v69_v36 = vrot.slane %v68_v28, 2  ;;  %v76_v37 = vrot.slane %v75_v29, 2  ;;  %p203_p8 = scmp.ne.s32.totalorder %s162_s26, %s202_s27  ;;  %p208_p10 = scmp.lt.s32.totalorder %s202_s27, %s202_s27 }
  0x1e   :  { %v56_v38 = vadd.f32 %v55_v30, %v54_v22  ;;  %v63_v39 = vadd.f32 %v62_v31, %v61_v23  ;;  %v82_v40 = vadd.f32 %v81_v32, %v80_v24  ;;  %v89_v41 = vadd.f32 %v88_v33, %v87_v25 }
  0x1f   :  { %v43_v42 = vrot.slane %v42_v34, 1  ;;  %v50_v43 = vrot.slane %v49_v35, 1  ;;  %v70_v44 = vadd.f32 %v69_v36, %v68_v28  ;;  %v77_v45 = vadd.f32 %v76_v37, %v75_v29  ;;  %p209_p11 = por %p208_p10, %p207_p9 }
  0x20   :  { %v57_v46 = vrot.slane %v56_v38, 1  ;;  %v64_v47 = vrot.slane %v63_v39, 1  ;;  %v83_v48 = vrot.slane %v82_v40, 2  ;;  %v90_v49 = vrot.slane %v89_v41, 2 }
  0x21   :  { %v44_v50 = vadd.f32 %v43_v42, %v42_v34  ;;  %v51_v51 = vadd.f32 %v50_v43, %v49_v35  ;;  %v71_v52 = vrot.slane %v70_v44, 1  ;;  %v78_v53 = vrot.slane %v77_v45, 1  ;;  %p210_p12 = pnand %p209_p11, %p203_p8 }
  0x22   :  { %v58_v54 = vadd.f32 %v57_v46, %v56_v38  ;;  %v65_v55 = vadd.f32 %v64_v47, %v63_v39  ;;  %v84_v56 = vadd.f32 %v83_v48, %v82_v40  ;;  %v91_v57 = vadd.f32 %v90_v49, %v89_v41 }
  0x23   :  { %v72_v58 = vadd.f32 %v71_v52, %v70_v44  ;;  %v79_v59 = vadd.f32 %v78_v53, %v77_v45  ;;  %v103_v60 = vsel %vm102_vm1, %v51_v51, %v44_v50  ;;  %vm108_vm4 = vcmask 1044484  }
  0x24   :  { %v85_v61 = vrot.slane %v84_v56, 1  ;;  %v92_v62 = vrot.slane %v91_v57, 1  ;;  %v105_v63 = vsel %vm104_vm2, %v58_v54, %v103_v60  ;;  %vm110_vm5 = vcmask 1045509  }
  0x25   :  { %v107_v0 = vsel %vm106_vm3, %v65_v55, %v105_v63  ;;  %vm112_vm6 = vcmask 1046534   ;;  %vm114_vm7 = vcmask 1047559   ;;  %vm153_vm8 = vcmask 130048  }
  0x26   :  { %v86_v1 = vadd.f32 %v85_v61, %v84_v56  ;;  %v93_v2 = vadd.f32 %v92_v62, %v91_v57  ;;  %v109_v3 = vsel %vm108_vm4, %v72_v58, %v107_v0 }
  0x27   :  { %v111_v4 = vsel %vm110_vm5, %v79_v59, %v109_v3 }
  0x28   :  { %v113_v5 = vsel %vm112_vm6, %v86_v1, %v111_v4 }
  0x29   :  { %v115_v6 = vsel %vm114_vm7, %v93_v2, %v113_v5 }
  0x2a   :  { %124 = vrot.lane.b32.xlu0 %v115_v6, %s231_s0  ;;  %132 = vrot.lane.b32.xlu1 %v115_v6, %s232_s20 }
  0x2e   :  { %128 = vrot.lane.b32.xlu0 %v115_v6, %s233_s21  ;;  %136 = vrot.lane.b32.xlu1 %v115_v6, %s234_s22 }
  0x32   :  { %140 = vrot.lane.b32.xlu0 %v115_v6, %s235_s23  ;;  %144 = vrot.lane.b32.xlu1 %v115_v6, %s229_s16 }
  0x36   :  { %148 = vrot.lane.b32.xlu0 %v115_v6, %s236_s24 }
  0x9c   :  { %v125_v7 = vpop.permute.xlu0 %124  ;;  %v133_v8 = vpop.permute.xlu1 %132 }
  0x9d   :  { %v127_v9 = vadd.f32 %v125_v7, %v115_v6 }
  0xa0   :  { %v129_v10 = vpop.permute.xlu0 %128  ;;  %v137_v11 = vpop.permute.xlu1 %136 }
  0xa1   :  { %v131_v12 = vadd.f32 %v129_v10, %v127_v9 }
  0xa3   :  { %v135_v13 = vadd.f32 %v133_v8, %v131_v12 }
  0xa4   :  { %v141_v14 = vpop.permute.xlu0 %140  ;;  %v145_v16 = vpop.permute.xlu1 %144 }
  0xa5   :  { %v139_v15 = vadd.f32 %v137_v11, %v135_v13 }
  0xa7   :  { %v143_v17 = vadd.f32 %v141_v14, %v139_v15 }
  0xa8   :  { %v149_v18 = vpop.permute.xlu0 %148 }
  0xa9   :  { %v147_v19 = vadd.f32 %v145_v16, %v143_v17 }
  0xab   :  { %v151_v20 = vadd.f32 %v149_v18, %v147_v19 }
  0xad   :  { %v152_v21 = vmul.f32 0.0625, %v151_v20 }
  0xaf   :  { %154 = vst.msk [vmem:[#allocation6] sm:$0xff] %vm153_vm8, %v152_v21 }
  0xb0   :  { %213 = shalt.err (!%p210_p12)
}
  0xb1   :  { %s214_s30 = scalar_lea.hbm %s287_s1, 128 }
  0xb2   :  { %p215_p13 = scmp.ne.s32.totalorder %s287_s1, %s214_s30  ;;  %p218_p0 = scmp.lt.u32.totalorder %s214_s30, %s287_s1 }
  0xb4   :  { %p220_p1 = pnand %p218_p0, %p215_p13 }
  0xb6   :  { %223 = shalt.err (!%p220_p1)
}
  0xb7   :  { %164 = dma.vmem_to_hbm [thread:$0]  %s162_s26, 128, %s287_s1, [#allocation5]  }
  0xb8   :  { %226 = dma.done.wait [#allocation5], 128  }
  0xb9   :  { %227 = vsyncadd [#allocation5], 4294967168 }
  0xba   :  { %168 = vsyncpa [#allocation4], 1 }
  0xbb   :  { %169 = vsyncpa [#allocation5], 1 }

</bundles_post_ra>
